<compile_context>
chip_gen: v6e
topology: v6e:2x2x1
jax: 0.10.0
libtpu: 0.0.40
codegen_flags: <defaults>
</compile_context>

<pallas_src>
import math

import jax
import jax.numpy as jnp
from jax import lax
from jax.experimental import pallas as pl
from jax.experimental.pallas import tpu as pltpu


# ---------------------------------------------------------------------------
# small helpers
# ---------------------------------------------------------------------------
def _round_up(x, m):
    return ((x + m - 1) // m) * m


def _node_tiling(n):
    """(n_pad, tile) for the node dim; tile=None selects the small-N batched path."""
    if n <= 256:
        return _round_up(n, 8), None
    n_pad = _round_up(n, 256)
    tile = 512 if n_pad % 512 == 0 else 256
    return n_pad, tile


def _row_tile(rows):
    for t in (1024, 512, 256, 128, 64, 32, 16, 8):
        if rows % t == 0:
            return t
    return rows


def _pick_group(bt, per_graph_bytes, budget=8 * 1024 * 1024):
    """Largest divisor of bt whose double-buffered working set fits `budget`."""
    g_max = max(1, budget // max(1, 2 * per_graph_bytes))
    g = 1
    for cand in range(1, bt + 1):
        if bt % cand == 0 and cand <= g_max:
            g = cand
    return g


def _vmem_cap_bytes():
    try:
        return int(pltpu.get_tpu_info().vmem_capacity_bytes * 3 // 4)
    except Exception:
        return 48 * 1024 * 1024          # safe headroom on v7x (64 MiB physical)


def _compiler_params(dim_sem, working_set_bytes):
    kwargs = {"dimension_semantics": dim_sem}
    if working_set_bytes > 24 * 1024 * 1024:
        kwargs["vmem_limit_bytes"] = min(int(working_set_bytes * 3 // 2),
                                         _vmem_cap_bytes())
    return pltpu.CompilerParams(**kwargs)


# ---------------------------------------------------------------------------
# Kernel A: y = d^{-1/2} * (x @ W)  over flattened (B*T*Np) rows, bf16 MXU
# ---------------------------------------------------------------------------
def _xw_scale_kernel(x_ref, w_ref, dis_ref, y_ref):
    xw = jnp.dot(x_ref[...], w_ref[...], preferred_element_type=jnp.float32)
    y_ref[...] = (dis_ref[...] * xw).astype(y_ref.dtype)


# ---------------------------------------------------------------------------
# Kernel B (large N): out = relu(d^{-1/2} * (aw @ y + w_ii * y_row))
#   aw = adj .* graph_weights (precomputed bf16), y resident per graph,
#   grid = (B*T, N/tm, N/tk), k last + "arbitrary", f32 accumulator scratch.
# ---------------------------------------------------------------------------
def _make_agg_kernel(tm, tk):
    def kernel(aw_ref, y_ref, nrm_ref, out_ref, acc_ref):
        k = pl.program_id(2)

        @pl.when(k == 0)
        def _init():
            acc_ref[...] = jnp.zeros_like(acc_ref)

        k0 = pl.multiple_of(k * tk, tk)
        acc_ref[...] += jnp.dot(aw_ref[...], y_ref[pl.ds(k0, tk), :],
                                preferred_element_type=jnp.float32)

        @pl.when(k == pl.num_programs(2) - 1)
        def _finalize():
            # self-loop of (adj + I) folded in as a diagonal correction, then
            # the d_i^{-1/2} row normalization, then the layer ReLU -- fused.
            i0 = pl.multiple_of(pl.program_id(1) * tm, tm)
            yrow = y_ref[pl.ds(i0, tm), :].astype(jnp.float32)
            nrm = nrm_ref[...]              # (tm, 2): [d^{-1/2}, d^{-1/2} * w_ii]
            res = nrm[:, 0:1] * acc_ref[...] + nrm[:, 1:2] * yrow
            out_ref[...] = jnp.maximum(res, 0.0).astype(out_ref.dtype)

    return kernel


# ---------------------------------------------------------------------------
# Kernel B (small N): G whole graphs per grid step, one batched einsum.
# ---------------------------------------------------------------------------
def _agg_small_kernel(aw_ref, y_ref, nrm_ref, out_ref):
    y = y_ref[...]
    acc = jnp.einsum("gij,gjf->gif", aw_ref[...], y,
                     preferred_element_type=jnp.float32)
    nrm = nrm_ref[...]                      # (G, Np, 2)
    res = nrm[:, :, 0:1] * acc + nrm[:, :, 1:2] * y.astype(jnp.float32)
    out_ref[...] = jnp.maximum(res, 0.0).astype(out_ref.dtype)


# ---------------------------------------------------------------------------
# One WeightedGCNLayer (+ReLU) on pre-padded inputs
# ---------------------------------------------------------------------------
def _gcn_layer_pallas(feat, aw_bf, norm, w_p, tile):
    """
    feat  : (BT, Np, Fin) bf16   node features (input / previous layer output)
    aw_bf : (BT, Np, Np)  bf16   adj .* graph_weights (no self loops), layer-invariant
    norm  : (BT, Np, 2)   f32    [:, :, 0] = d^{-1/2}, [:, :, 1] = d^{-1/2} * w_ii
    w_p   : (Fin, Fp)     bf16   linear weight (torch W.T), zero padded
    returns (BT, Np, Fp)  bf16
    """
    bt, n_pad, f_in = feat.shape
    f_pad = w_p.shape[1]

    # --- pass 1: y = d^{-1/2} * (x @ W) ------------------------------------
    rows = bt * n_pad
    tm_a = _row_tile(rows)
    x2 = feat.reshape(rows, f_in)
    dis2 = norm[:, :, 0].reshape(rows, 1)
    ws_a = 2 * (tm_a * f_in * 2 + f_in * f_pad * 2 + tm_a * 4 + tm_a * f_pad * 2)
    y2 = pl.pallas_call(
        _xw_scale_kernel,
        out_shape=jax.ShapeDtypeStruct((rows, f_pad), jnp.bfloat16),
        grid_spec=pltpu.PrefetchScalarGridSpec(
            num_scalar_prefetch=0,
            grid=(rows // tm_a,),
            in_specs=[
                pl.BlockSpec((tm_a, f_in), lambda i: (i, 0)),
                pl.BlockSpec((f_in, f_pad), lambda i: (0, 0)),
                pl.BlockSpec((tm_a, 1), lambda i: (i, 0)),
            ],
            out_specs=pl.BlockSpec((tm_a, f_pad), lambda i: (i, 0)),
        ),
        compiler_params=_compiler_params(("parallel",), ws_a),
    )(x2, w_p, dis2)
    y = y2.reshape(bt, n_pad, f_pad)

    # --- pass 2: aggregation + diag correction + d^{-1/2} scale + ReLU -----
    if tile is None:
        # small-N path: G whole graphs per grid step (fills the MXU / amortizes
        # the ~0.35us per-step overhead for tiny graphs).
        per_graph = (n_pad * n_pad * 2 + 2 * n_pad * f_pad * 2
                     + n_pad * 128 * 4)          # norm lane-padded in VMEM
        g = _pick_group(bt, per_graph)
        cost = pl.CostEstimate(
            flops=int(2 * bt * n_pad * n_pad * f_pad),
            transcendentals=0,
            bytes_accessed=int(bt * (n_pad * n_pad * 2
                                     + 2 * n_pad * f_pad * 2 + n_pad * 8)),
        )
        return pl.pallas_call(
            _agg_small_kernel,
            out_shape=jax.ShapeDtypeStruct((bt, n_pad, f_pad), jnp.bfloat16),
            grid_spec=pltpu.PrefetchScalarGridSpec(
                num_scalar_prefetch=0,
                grid=(bt // g,),
                in_specs=[
                    pl.BlockSpec((g, n_pad, n_pad), lambda b: (b, 0, 0)),
                    pl.BlockSpec((g, n_pad, f_pad), lambda b: (b, 0, 0)),
                    pl.BlockSpec((g, n_pad, 2), lambda b: (b, 0, 0)),
                ],
                out_specs=pl.BlockSpec((g, n_pad, f_pad), lambda b: (b, 0, 0)),
            ),
            compiler_params=_compiler_params(("parallel",), 2 * g * per_graph),
            cost_estimate=cost,
        )(aw_bf, y, norm)

    # large-N path
    tm = tk = tile
    ws_b = (2 * tm * tk * 2                  # aw tile, double buffered
            + 2 * n_pad * f_pad * 2          # y resident per graph
            + 2 * tm * 128 * 4               # norm tile (lane padded in VMEM)
            + 2 * tm * f_pad * 2             # output tile
            + tm * f_pad * 4)                # accumulator scratch
    cost = pl.CostEstimate(
        flops=int(2 * bt * n_pad * n_pad * f_pad),
        transcendentals=0,
        bytes_accessed=int(bt * (n_pad * n_pad * 2 + 2 * n_pad * f_pad * 2
                                 + n_pad * 8)),
    )
    return pl.pallas_call(
        _make_agg_kernel(tm, tk),
        out_shape=jax.ShapeDtypeStruct((bt, n_pad, f_pad), jnp.bfloat16),
        grid_spec=pltpu.PrefetchScalarGridSpec(
            num_scalar_prefetch=0,
            grid=(bt, n_pad // tm, n_pad // tk),
            in_specs=[
                pl.BlockSpec((None, tm, tk), lambda b, i, k: (b, i, k)),
                # y is read-only and resident for the whole graph; both the
                # k-tile and the row-tile are sliced from it inside the kernel.
                pl.BlockSpec((None, n_pad, f_pad), lambda b, i, k: (b, 0, 0)),
                pl.BlockSpec((None, tm, 2), lambda b, i, k: (b, i, 0)),
            ],
            out_specs=pl.BlockSpec((None, tm, f_pad), lambda b, i, k: (b, i, 0)),
            scratch_shapes=[pltpu.VMEM((tm, f_pad), jnp.float32)],
        ),
        compiler_params=_compiler_params(
            ("parallel", "parallel", "arbitrary"), ws_b),
        cost_estimate=cost,
    )(aw_bf, y, norm)


# ---------------------------------------------------------------------------
# LSTM (torch nn.LSTM, single layer, batch_first, h0=c0=0) and FC in plain JAX
# TODO(synk): LSTM recurrence + final Linear + node-mean are tiny sequential /
#             reduction ops; left as jnp/lax.scan instead of a Pallas kernel.
# ---------------------------------------------------------------------------
def _lstm_forward(p, x):
    w_ih, w_hh = p["w_ih"], p["w_hh"]
    b = p["b_ih"] + p["b_hh"]
    bsz, _, hidden = x.shape

    def step(carry, x_t):
        h, c = carry
        gates = x_t @ w_ih.T + h @ w_hh.T + b
        i, f, g, o = jnp.split(gates, 4, axis=-1)
        i = jax.nn.sigmoid(i)
        f = jax.nn.sigmoid(f)
        g = jnp.tanh(g)
        o = jax.nn.sigmoid(o)
        c = f * c + i * g
        h = o * jnp.tanh(c)
        return (h, c), h

    h0 = jnp.zeros((bsz, hidden), x.dtype)
    c0 = jnp.zeros((bsz, hidden), x.dtype)
    _, hs = lax.scan(step, (h0, c0), jnp.swapaxes(x, 0, 1))
    return jnp.swapaxes(hs, 0, 1)


# ---------------------------------------------------------------------------
# Full DynamicWeightedGCN forward
# ---------------------------------------------------------------------------
def dynamic_weighted_gcn_forward(params, x, adj, weights):
    B, T, N, F_in = x.shape
    H = params["gcn_w"][0].shape[1]
    bt = B * T

    xf = x.reshape(bt, N, F_in).astype(jnp.float32)
    adjf = adj.reshape(bt, N, N).astype(jnp.float32)
    wgtf = weights.reshape(bt, N, N).astype(jnp.float32)

    # Layer-invariant pieces, computed once and shared by all GCN layers:
    #   aw   = adj .* graph_weights (single bf16 N^2 stream for kernel B)
    #   deg  = rowsum(adj + I)  ->  d^{-1/2}  (rsqrt on EUP, no isinf chain)
    #   norm = [d^{-1/2}, d^{-1/2} * w_ii]  (self loop folded as a diag fix)
    deg = adjf.sum(-1) + 1.0
    dis = jnp.where(deg > 0, lax.rsqrt(deg), 0.0)
    wdiag = jnp.diagonal(wgtf, axis1=-2, axis2=-1)
    aw = adjf * wgtf

    n_pad, tile = _node_tiling(N)
    f_pad = _round_up(H, 128)
    pad_n = n_pad - N

    # Padded rows/cols of aw, wdiag and x are zero and dis is padded with 1.0,
    # so padded node outputs are exactly 0 and are dropped before the mean.
    aw_bf = jnp.pad(aw, ((0, 0), (0, pad_n), (0, pad_n))).astype(jnp.bfloat16)
    dis_p = jnp.pad(dis, ((0, 0), (0, pad_n)), constant_values=1.0)
    wdiag_p = jnp.pad(wdiag, ((0, 0), (0, pad_n)))
    norm = jnp.stack([dis_p, dis_p * wdiag_p], axis=-1)      # (bt, Np, 2) f32
    feat = jnp.pad(xf, ((0, 0), (0, pad_n), (0, 0))).astype(jnp.bfloat16)

    for w_lin in params["gcn_w"]:
        f_in_l, f_out_l = w_lin.shape
        row_pad = feat.shape[-1] - f_in_l      # padded input features -> zero rows
        w_p = jnp.pad(w_lin, ((0, row_pad), (0, f_pad - f_out_l))
                      ).astype(jnp.bfloat16)
        feat = _gcn_layer_pallas(feat, aw_bf, norm, w_p, tile)

    # drop padding, mean over nodes, LSTM, final Linear (tiny ops, plain JAX)
    gcn_out = feat[:, :N, :H].astype(jnp.float32).reshape(B, T, N, H).mean(axis=2)
    lstm_out = _lstm_forward(params["lstm"], gcn_out)
    return lstm_out @ params["fc_w"].T + params["fc_b"]


# ---------------------------------------------------------------------------
# parameters (deterministic) and pure-JAX reference for correctness
# ---------------------------------------------------------------------------
def init_params(key, in_features, hidden, out_features, num_layers):
    keys = jax.random.split(key, num_layers + 5)
    gcn_w = []
    for i in range(num_layers):
        fan_in = in_features if i == 0 else hidden
        bound = 1.0 / math.sqrt(fan_in)
        # stored as (F_in, F_out) == torch weight.T
        gcn_w.append(jax.random.uniform(keys[i], (fan_in, hidden), jnp.float32,
                                        -bound, bound))
    hb = 1.0 / math.sqrt(hidden)
    lstm = {
        "w_ih": jax.random.uniform(keys[num_layers + 0], (4 * hidden, hidden),
                                   jnp.float32, -hb, hb),
        "w_hh": jax.random.uniform(keys[num_layers + 1], (4 * hidden, hidden),
                                   jnp.float32, -hb, hb),
        "b_ih": jax.random.uniform(keys[num_layers + 2], (4 * hidden,),
                                   jnp.float32, -hb, hb),
        "b_hh": jnp.zeros((4 * hidden,), jnp.float32),
    }
    fc_w = jax.random.uniform(keys[num_layers + 3], (out_features, hidden),
                              jnp.float32, -hb, hb)
    fc_b = jax.random.uniform(keys[num_layers + 4], (out_features,),
                              jnp.float32, -hb, hb)
    return {"gcn_w": gcn_w, "lstm": lstm, "fc_w": fc_w, "fc_b": fc_b}


def reference_forward(params, x, adj, weights):
    B, T, N, _ = x.shape
    eye = jnp.eye(N, dtype=jnp.float32)

    def gcn_layer(xt, a, w, w_lin):
        a_hat = a + eye
        deg = a_hat.sum(-1, keepdims=True)
        dis = jnp.where(deg > 0, deg ** -0.5, 0.0)
        a_norm = dis * a_hat * jnp.swapaxes(dis, -1, -2)
        return (a_norm * w) @ (xt @ w_lin)

    outs = []
    for t in range(T):
        xt = x[:, t].astype(jnp.float32)
        for w_lin in params["gcn_w"]:
            xt = jax.nn.relu(gcn_layer(xt, adj[:, t].astype(jnp.float32),
                                       weights[:, t].astype(jnp.float32), w_lin))
        outs.append(xt)
    g = jnp.stack(outs, axis=1).mean(axis=2)
    lstm_out = _lstm_forward(params["lstm"], g)
    return lstm_out @ params["fc_w"].T + params["fc_b"]


# ---------------------------------------------------------------------------
if __name__ == "__main__":
    key = jax.random.PRNGKey(0)
    B, T, N = 2, 4, 16
    F_IN, HIDDEN, F_OUT, NUM_LAYERS = 8, 32, 4, 2

    k_x, k_a, k_w, k_p = jax.random.split(key, 4)
    x = jax.random.normal(k_x, (B, T, N, F_IN), jnp.float32)
    adj = (jax.random.uniform(k_a, (B, T, N, N)) > 0.5).astype(jnp.float32)
    adj = jnp.maximum(adj, jnp.swapaxes(adj, -1, -2))   # symmetric 0/1 adjacency
    wgt = jax.random.uniform(k_w, (B, T, N, N), jnp.float32)

    params = init_params(k_p, F_IN, HIDDEN, F_OUT, NUM_LAYERS)

    fwd = jax.jit(dynamic_weighted_gcn_forward)
    out = jax.block_until_ready(fwd(params, x, adj, wgt))

    ref = reference_forward(params, x, adj, wgt)
    assert out.shape == (B, T, F_OUT)
    err = float(jnp.max(jnp.abs(out - ref)))
    scale = float(jnp.max(jnp.abs(ref)))
    assert err <= 5e-2 * (1.0 + scale), f"max abs error {err} vs scale {scale}"

    print("KERNEL_OK")
</pallas_src>

<mosaic_0001>
module attributes {stable_mosaic.version = 11 : i64} {
  func.func @_xw_scale_kernel(%arg0: i32, %arg1: memref<128x8xbf16, #tpu.memory_space<vmem>>, %arg2: memref<8x128xbf16, #tpu.memory_space<vmem>>, %arg3: memref<128x1xf32, #tpu.memory_space<vmem>>, %arg4: memref<128x128xbf16, #tpu.memory_space<vmem>>) attributes {dimension_semantics = [#tpu.dimension_semantics<parallel>], iteration_bounds = array<i64: 1>, scalar_prefetch = 0 : i64, scratch_operands = 0 : i64, tpu.core_type = #tpu.core_type<tc>, window_params = [{transform_indices = @transform_0, window_bounds = array<i64: 128, 8>}, {pipeline_mode = #tpu.pipeline_mode<synchronous>, transform_indices = @transform_1, window_bounds = array<i64: 8, 128>}, {transform_indices = @transform_2, window_bounds = array<i64: 128, 1>}, {transform_indices = @transform_3, window_bounds = array<i64: 128, 128>}]} {
    %c0 = arith.constant 0 : index
    %c0_0 = arith.constant 0 : index
    %0 = vector.load %arg1[%c0, %c0_0] : memref<128x8xbf16, #tpu.memory_space<vmem>>, vector<128x8xbf16>
    %c0_1 = arith.constant 0 : index
    %c0_2 = arith.constant 0 : index
    %1 = vector.load %arg2[%c0_1, %c0_2] : memref<8x128xbf16, #tpu.memory_space<vmem>>, vector<8x128xbf16>
    %cst = arith.constant dense<0.000000e+00> : vector<128x128xf32>
    %2 = tpu.matmul %0, %1, %cst {dimension_numbers = #tpu.dot_dimension_numbers<[1], [0], [0], [1], [0, 0, 1, 1], [], []>} : vector<128x8xbf16>, vector<8x128xbf16>, vector<128x128xf32> -> vector<128x128xf32>
    %c0_3 = arith.constant 0 : index
    %c0_4 = arith.constant 0 : index
    %3 = vector.load %arg3[%c0_3, %c0_4] : memref<128x1xf32, #tpu.memory_space<vmem>>, vector<128x1xf32>
    %4 = vector.broadcast %3 : vector<128x1xf32> to vector<128x128xf32>
    %5 = arith.mulf %4, %2 : vector<128x128xf32>
    %6 = arith.truncf %5 : vector<128x128xf32> to vector<128x128xbf16>
    %c0_5 = arith.constant 0 : index
    %c0_6 = arith.constant 0 : index
    %7 = vector.load %arg4[%c0_5, %c0_6] : memref<128x128xbf16, #tpu.memory_space<vmem>>, vector<128x128xbf16>
    tpu.vector_store %arg4[%c0_5, %c0_6], %6 {strides = array<i32>} : memref<128x128xbf16, #tpu.memory_space<vmem>>, vector<128x128xbf16>,
    return
  }
  func.func @transform_0(%arg0: i32) -> (i32, i32) {
    %c0_i32 = arith.constant 0 : i32
    %c0_i32_0 = arith.constant 0 : i32
    return %arg0, %c0_i32 : i32, i32
  }
  func.func @transform_1(%arg0: i32) -> (i32, i32) {
    %c0_i32 = arith.constant 0 : i32
    %c0_i32_0 = arith.constant 0 : i32
    %c0_i32_1 = arith.constant 0 : i32
    return %c0_i32, %c0_i32_0 : i32, i32
  }
  func.func @transform_2(%arg0: i32) -> (i32, i32) {
    %c0_i32 = arith.constant 0 : i32
    %c0_i32_0 = arith.constant 0 : i32
    return %arg0, %c0_i32 : i32, i32
  }
  func.func @transform_3(%arg0: i32) -> (i32, i32) {
    %c0_i32 = arith.constant 0 : i32
    %c0_i32_0 = arith.constant 0 : i32
    return %arg0, %c0_i32 : i32, i32
  }
}

module attributes {stable_mosaic.version = 11 : i64} {
  func.func @_agg_small_kernel(%arg0: i32, %arg1: memref<8x16x16xbf16, #tpu.memory_space<vmem>>, %arg2: memref<8x16x128xbf16, #tpu.memory_space<vmem>>, %arg3: memref<8x16x2xf32, #tpu.memory_space<vmem>>, %arg4: memref<8x16x128xbf16, #tpu.memory_space<vmem>>) attributes {dimension_semantics = [#tpu.dimension_semantics<parallel>], iteration_bounds = array<i64: 1>, scalar_prefetch = 0 : i64, scratch_operands = 0 : i64, tpu.core_type = #tpu.core_type<tc>, window_params = [{transform_indices = @transform_0, window_bounds = array<i64: 8, 16, 16>}, {transform_indices = @transform_1, window_bounds = array<i64: 8, 16, 128>}, {transform_indices = @transform_2, window_bounds = array<i64: 8, 16, 2>}, {transform_indices = @transform_3, window_bounds = array<i64: 8, 16, 128>}]} {
    %c0 = arith.constant 0 : index
    %c0_0 = arith.constant 0 : index
    %c0_1 = arith.constant 0 : index
    %0 = vector.load %arg2[%c0, %c0_0, %c0_1] : memref<8x16x128xbf16, #tpu.memory_space<vmem>>, vector<8x16x128xbf16>
    %c0_2 = arith.constant 0 : index
    %c0_3 = arith.constant 0 : index
    %c0_4 = arith.constant 0 : index
    %1 = vector.load %arg1[%c0_2, %c0_3, %c0_4] : memref<8x16x16xbf16, #tpu.memory_space<vmem>>, vector<8x16x16xbf16>
    "tpu.trace_start"() <{level = 10 : i32, message = "gij,gjf->gif"}> : () -> ()
    %cst = arith.constant dense<0.000000e+00> : vector<8x16x128xf32>
    %2 = tpu.matmul %1, %0, %cst {dimension_numbers = #tpu.dot_dimension_numbers<[2], [1], [1], [2], [0, 0, 0, 1, 1, 2], [0], [0]>} : vector<8x16x16xbf16>, vector<8x16x128xbf16>, vector<8x16x128xf32> -> vector<8x16x128xf32>
    "tpu.trace_stop"() : () -> ()
    %c0_5 = arith.constant 0 : index
    %c0_6 = arith.constant 0 : index
    %c0_7 = arith.constant 0 : index
    %3 = vector.load %arg3[%c0_5, %c0_6, %c0_7] : memref<8x16x2xf32, #tpu.memory_space<vmem>>, vector<8x16x2xf32>
    %4 = vector.extract_strided_slice %3 {offsets = [0, 0, 0], sizes = [8, 16, 1], strides = [1, 1, 1]} : vector<8x16x2xf32> to vector<8x16x1xf32>
    %5 = vector.broadcast %4 : vector<8x16x1xf32> to vector<8x16x128xf32>
    %6 = arith.mulf %5, %2 : vector<8x16x128xf32>
    %7 = vector.extract_strided_slice %3 {offsets = [0, 0, 1], sizes = [8, 16, 1], strides = [1, 1, 1]} : vector<8x16x2xf32> to vector<8x16x1xf32>
    %8 = arith.extf %0 : vector<8x16x128xbf16> to vector<8x16x128xf32>
    %9 = vector.broadcast %7 : vector<8x16x1xf32> to vector<8x16x128xf32>
    %10 = arith.mulf %9, %8 : vector<8x16x128xf32>
    %11 = arith.addf %6, %10 : vector<8x16x128xf32>
    %cst_8 = arith.constant 0.000000e+00 : f32
    %12 = vector.broadcast %cst_8 : f32 to vector<8x16x128xf32>
    %13 = arith.maximumf %11, %12 : vector<8x16x128xf32>
    %14 = arith.truncf %13 : vector<8x16x128xf32> to vector<8x16x128xbf16>
    %c0_9 = arith.constant 0 : index
    %c0_10 = arith.constant 0 : index
    %c0_11 = arith.constant 0 : index
    %15 = vector.load %arg4[%c0_9, %c0_10, %c0_11] : memref<8x16x128xbf16, #tpu.memory_space<vmem>>, vector<8x16x128xbf16>
    tpu.vector_store %arg4[%c0_9, %c0_10, %c0_11], %14 {strides = array<i32>} : memref<8x16x128xbf16, #tpu.memory_space<vmem>>, vector<8x16x128xbf16>,
    return
  }
  func.func @transform_0(%arg0: i32) -> (i32, i32, i32) {
    %c0_i32 = arith.constant 0 : i32
    %c0_i32_0 = arith.constant 0 : i32
    %c0_i32_1 = arith.constant 0 : i32
    return %arg0, %c0_i32, %c0_i32_0 : i32, i32, i32
  }
  func.func @transform_1(%arg0: i32) -> (i32, i32, i32) {
    %c0_i32 = arith.constant 0 : i32
    %c0_i32_0 = arith.constant 0 : i32
    %c0_i32_1 = arith.constant 0 : i32
    return %arg0, %c0_i32, %c0_i32_0 : i32, i32, i32
  }
  func.func @transform_2(%arg0: i32) -> (i32, i32, i32) {
    %c0_i32 = arith.constant 0 : i32
    %c0_i32_0 = arith.constant 0 : i32
    %c0_i32_1 = arith.constant 0 : i32
    return %arg0, %c0_i32, %c0_i32_0 : i32, i32, i32
  }
  func.func @transform_3(%arg0: i32) -> (i32, i32, i32) {
    %c0_i32 = arith.constant 0 : i32
    %c0_i32_0 = arith.constant 0 : i32
    %c0_i32_1 = arith.constant 0 : i32
    return %arg0, %c0_i32, %c0_i32_0 : i32, i32, i32
  }
}

module attributes {stable_mosaic.version = 11 : i64} {
  func.func @_xw_scale_kernel(%arg0: i32, %arg1: memref<128x128xbf16, #tpu.memory_space<vmem>>, %arg2: memref<128x128xbf16, #tpu.memory_space<vmem>>, %arg3: memref<128x1xf32, #tpu.memory_space<vmem>>, %arg4: memref<128x128xbf16, #tpu.memory_space<vmem>>) attributes {dimension_semantics = [#tpu.dimension_semantics<parallel>], iteration_bounds = array<i64: 1>, scalar_prefetch = 0 : i64, scratch_operands = 0 : i64, tpu.core_type = #tpu.core_type<tc>, window_params = [{transform_indices = @transform_0, window_bounds = array<i64: 128, 128>}, {pipeline_mode = #tpu.pipeline_mode<synchronous>, transform_indices = @transform_1, window_bounds = array<i64: 128, 128>}, {transform_indices = @transform_2, window_bounds = array<i64: 128, 1>}, {transform_indices = @transform_3, window_bounds = array<i64: 128, 128>}]} {
    %c0 = arith.constant 0 : index
    %c0_0 = arith.constant 0 : index
    %0 = vector.load %arg1[%c0, %c0_0] : memref<128x128xbf16, #tpu.memory_space<vmem>>, vector<128x128xbf16>
    %c0_1 = arith.constant 0 : index
    %c0_2 = arith.constant 0 : index
    %1 = vector.load %arg2[%c0_1, %c0_2] : memref<128x128xbf16, #tpu.memory_space<vmem>>, vector<128x128xbf16>
    %cst = arith.constant dense<0.000000e+00> : vector<128x128xf32>
    %2 = tpu.matmul %0, %1, %cst {dimension_numbers = #tpu.dot_dimension_numbers<[1], [0], [0], [1], [0, 0, 1, 1], [], []>} : vector<128x128xbf16>, vector<128x128xbf16>, vector<128x128xf32> -> vector<128x128xf32>
    %c0_3 = arith.constant 0 : index
    %c0_4 = arith.constant 0 : index
    %3 = vector.load %arg3[%c0_3, %c0_4] : memref<128x1xf32, #tpu.memory_space<vmem>>, vector<128x1xf32>
    %4 = vector.broadcast %3 : vector<128x1xf32> to vector<128x128xf32>
    %5 = arith.mulf %4, %2 : vector<128x128xf32>
    %6 = arith.truncf %5 : vector<128x128xf32> to vector<128x128xbf16>
    %c0_5 = arith.constant 0 : index
    %c0_6 = arith.constant 0 : index
    %7 = vector.load %arg4[%c0_5, %c0_6] : memref<128x128xbf16, #tpu.memory_space<vmem>>, vector<128x128xbf16>
    tpu.vector_store %arg4[%c0_5, %c0_6], %6 {strides = array<i32>} : memref<128x128xbf16, #tpu.memory_space<vmem>>, vector<128x128xbf16>,
    return
  }
  func.func @transform_0(%arg0: i32) -> (i32, i32) {
    %c0_i32 = arith.constant 0 : i32
    %c0_i32_0 = arith.constant 0 : i32
    return %arg0, %c0_i32 : i32, i32
  }
  func.func @transform_1(%arg0: i32) -> (i32, i32) {
    %c0_i32 = arith.constant 0 : i32
    %c0_i32_0 = arith.constant 0 : i32
    %c0_i32_1 = arith.constant 0 : i32
    return %c0_i32, %c0_i32_0 : i32, i32
  }
  func.func @transform_2(%arg0: i32) -> (i32, i32) {
    %c0_i32 = arith.constant 0 : i32
    %c0_i32_0 = arith.constant 0 : i32
    return %arg0, %c0_i32 : i32, i32
  }
  func.func @transform_3(%arg0: i32) -> (i32, i32) {
    %c0_i32 = arith.constant 0 : i32
    %c0_i32_0 = arith.constant 0 : i32
    return %arg0, %c0_i32 : i32, i32
  }
}

</mosaic_0001>

<bundles_post_ra>
// kernel: custom-call.4
= control target key start
LH: loop header
LB: loop body
LE: loop exit
PB: predicated region body
PF: predicated region fallthrough
CT: control target
= control target key end

     0   :  { %s6_s0 = inlined_call_operand.vmem [shape: bf16[4,2,32], index: 0, kind: output, shape index: {}]  }

// kernel: custom-call.3
= control target key start
LH: loop header
LB: loop body
LE: loop exit
PB: predicated region body
PF: predicated region fallthrough
CT: control target
= control target key end

     0   :  { %s6_s0 = inlined_call_operand.vmem [shape: f32[2,32], index: 0, kind: output, shape index: {}]  }

// kernel: custom-call.2
= control target key start
LH: loop header
LB: loop body
LE: loop exit
PB: predicated region body
PF: predicated region fallthrough
CT: control target
= control target key end

     0   :  { %s6_s0 = inlined_call_operand.vmem [shape: bf16[2,32], index: 0, kind: output, shape index: {}]  }

</bundles_post_ra>
